<compile_context>
chip_gen: v7x
topology: tpu7x:2x2x1
jax: 0.10.0
libtpu: 0.0.40
codegen_flags: <defaults>
</compile_context>

<pallas_src>
import functools

import jax
import jax.numpy as jnp
from jax import lax
from jax.experimental import pallas as pl
from jax.experimental.pallas import tpu as pltpu


_BLOCK_BYTES = 2 << 20                  # per-input, per-pipeline-buffer budget
_VMEM_LIMIT_BYTES = 48 * 1024 * 1024    # <= v7x physical VMEM, ample on v5e/v6e


def _sublane_multiple(dtype):
    """Native sublane packing multiple: 8 (f32), 16 (bf16), 32 (int8/fp8)."""
    return max(8, 32 // max(1, jnp.dtype(dtype).itemsize))


def _pow_terms(pr, tg, p_pow):
    """predict**p + target**p, keeping integer powers on the VPU."""
    if p_pow == 2:
        return pr * pr + tg * tg
    if float(p_pow) == int(p_pow) and int(p_pow) > 0:
        ip = int(p_pow)
        return lax.integer_pow(pr, ip) + lax.integer_pow(tg, ip)
    # True float exponent: EUP exp/log path (matches torch .pow semantics).
    return jnp.power(pr, p_pow) + jnp.power(tg, p_pow)


def _pick_chunk(total, cap, mult):
    """Largest chunk <= cap that is a multiple of `mult`, preferring an exact
    divisor of `total` (=> no ragged tail, mask becomes free)."""
    cap = max(mult, cap // mult * mult)
    for c in range(cap, 0, -mult):
        if total % c == 0:
            if 2 * c >= cap:
                return c, False
            break
    return cap, True


# ---------------------------------------------------------------------------
# Dense row-packed path: D % 128 == 0, several batch rows per block.
# ---------------------------------------------------------------------------
def _dice_kernel_rowpack(p_ref, t_ref, loss_ref, *, smooth, p_pow):
    pr = p_ref[...].astype(jnp.float32)          # (b_tile, R, 128)
    tg = t_ref[...].astype(jnp.float32)
    num_t = pr * tg
    den_t = _pow_terms(pr, tg, p_pow)
    # One reduce per block of data (no redundant per-step reduction): sublane
    # axis first, then a single lane reduce per batch row.
    num = jnp.sum(jnp.sum(num_t, axis=1), axis=1, keepdims=True) + smooth
    den = jnp.sum(jnp.sum(den_t, axis=1), axis=1, keepdims=True) + smooth
    loss_ref[...] = jnp.broadcast_to(1.0 - num / den, loss_ref.shape)


def _dice_rowpack(pr3, tg3, smooth, p_pow, block_bytes):
    n, r, _ = pr3.shape
    itemsize = jnp.dtype(pr3.dtype).itemsize
    row_bytes = r * 128 * itemsize
    if n * row_bytes <= block_bytes:
        b_tile = n                                    # single batch block
    else:
        b_tile = max(8, min(block_bytes // row_bytes, n) // 8 * 8)
    d = r * 128
    cost = pl.CostEstimate(flops=6 * n * d, transcendentals=0,
                           bytes_accessed=2 * n * d * itemsize + n * 128 * 4)
    kernel = functools.partial(_dice_kernel_rowpack,
                               smooth=float(smooth), p_pow=p_pow)
    out = pl.pallas_call(
        kernel,
        out_shape=jax.ShapeDtypeStruct((n, 128), jnp.float32),
        grid_spec=pltpu.PrefetchScalarGridSpec(
            num_scalar_prefetch=0,
            grid=(pl.cdiv(n, b_tile),),
            in_specs=[
                pl.BlockSpec((b_tile, r, 128), lambda i: (i, 0, 0)),
                pl.BlockSpec((b_tile, r, 128), lambda i: (i, 0, 0)),
            ],
            out_specs=pl.BlockSpec((b_tile, 128), lambda i: (i, 0)),
        ),
        compiler_params=pltpu.CompilerParams(
            dimension_semantics=("parallel",),
            vmem_limit_bytes=_VMEM_LIMIT_BYTES,
        ),
        cost_estimate=cost,
    )(pr3, tg3)
    return out[:, 0]


# ---------------------------------------------------------------------------
# Dense big-row path: one batch row's features exceed the block budget.
# ---------------------------------------------------------------------------
def _dice_kernel_bigrow(p_ref, t_ref, loss_ref, num_acc, den_acc, *,
                        smooth, p_pow, n_rows, mask_rows):
    k = pl.program_id(1)
    last = pl.num_programs(1) - 1

    @pl.when(k == 0)
    def _():
        num_acc[...] = jnp.zeros_like(num_acc)
        den_acc[...] = jnp.zeros_like(den_acc)

    pr = p_ref[...].astype(jnp.float32)          # (r_chunk, 128)
    tg = t_ref[...].astype(jnp.float32)
    r_chunk = pr.shape[0]

    def accumulate(pv, tv):                      # pure VPU, no reduce in loop
        num_acc[...] += pv * tv
        den_acc[...] += _pow_terms(pv, tv, p_pow)

    if mask_rows:
        # Ragged tail: pay the iota/compare/select only on the last step.
        @pl.when(k < last)
        def _():
            accumulate(pr, tg)

        @pl.when(k == last)
        def _():
            row = lax.broadcasted_iota(jnp.int32, (r_chunk, 128), 0)
            valid = (k * r_chunk + row) < n_rows
            accumulate(jnp.where(valid, pr, 0.0), jnp.where(valid, tg, 0.0))
    else:
        accumulate(pr, tg)

    @pl.when(k == last)
    def _():
        num = jnp.sum(num_acc[...], keepdims=True) + smooth      # (1, 1)
        den = jnp.sum(den_acc[...], keepdims=True) + smooth
        loss_ref[...] = jnp.broadcast_to(1.0 - num / den, loss_ref.shape)


def _dice_bigrow(pr3, tg3, smooth, p_pow, block_bytes):
    n, r, _ = pr3.shape
    itemsize = jnp.dtype(pr3.dtype).itemsize
    sub = _sublane_multiple(pr3.dtype)
    cap = max(sub, block_bytes // (128 * itemsize))
    r_chunk, mask_rows = _pick_chunk(r, cap, sub)
    d = r * 128
    cost = pl.CostEstimate(flops=6 * n * d, transcendentals=0,
                           bytes_accessed=2 * n * d * itemsize + n * 128 * 4)
    kernel = functools.partial(_dice_kernel_bigrow, smooth=float(smooth),
                               p_pow=p_pow, n_rows=r, mask_rows=mask_rows)
    out = pl.pallas_call(
        kernel,
        out_shape=jax.ShapeDtypeStruct((n, 1, 128), jnp.float32),
        grid_spec=pltpu.PrefetchScalarGridSpec(
            num_scalar_prefetch=0,
            grid=(n, pl.cdiv(r, r_chunk)),
            in_specs=[
                pl.BlockSpec((None, r_chunk, 128), lambda b, k: (b, k, 0)),
                pl.BlockSpec((None, r_chunk, 128), lambda b, k: (b, k, 0)),
            ],
            out_specs=pl.BlockSpec((None, 1, 128), lambda b, k: (b, 0, 0)),
            scratch_shapes=[
                pltpu.VMEM((r_chunk, 128), jnp.float32),
                pltpu.VMEM((r_chunk, 128), jnp.float32),
            ],
        ),
        compiler_params=pltpu.CompilerParams(
            dimension_semantics=("parallel", "arbitrary"),
            vmem_limit_bytes=_VMEM_LIMIT_BYTES,
        ),
        cost_estimate=cost,
    )(pr3, tg3)
    return out[:, 0, 0]


# ---------------------------------------------------------------------------
# Flat fallback: arbitrary D (not 128-aligned).  2-D (batch, feature) tiling.
# ---------------------------------------------------------------------------
def _dice_kernel_flat(p_ref, t_ref, loss_ref, num_acc, den_acc, *,
                      smooth, p_pow, n_cols, mask_cols):
    k = pl.program_id(1)
    last = pl.num_programs(1) - 1

    @pl.when(k == 0)
    def _():
        num_acc[...] = jnp.zeros_like(num_acc)
        den_acc[...] = jnp.zeros_like(den_acc)

    pr = p_ref[...].astype(jnp.float32)          # (n_tile, col_tile)
    tg = t_ref[...].astype(jnp.float32)
    n_tile, col_tile = pr.shape

    def accumulate(pv, tv):                      # pure VPU, no reduce in loop
        num_acc[...] += pv * tv
        den_acc[...] += _pow_terms(pv, tv, p_pow)

    if mask_cols:
        @pl.when(k < last)
        def _():
            accumulate(pr, tg)

        @pl.when(k == last)
        def _():
            col = lax.broadcasted_iota(jnp.int32, (n_tile, col_tile), 1)
            valid = (k * col_tile + col) < n_cols
            accumulate(jnp.where(valid, pr, 0.0), jnp.where(valid, tg, 0.0))
    else:
        accumulate(pr, tg)

    @pl.when(k == last)
    def _():
        num = jnp.sum(num_acc[...], axis=1, keepdims=True) + smooth  # (n_tile,1)
        den = jnp.sum(den_acc[...], axis=1, keepdims=True) + smooth
        loss_ref[...] = jnp.broadcast_to(1.0 - num / den, loss_ref.shape)


def _dice_flat(pr2, tg2, smooth, p_pow, block_bytes):
    n, d = pr2.shape
    itemsize = jnp.dtype(pr2.dtype).itemsize
    sub = _sublane_multiple(pr2.dtype)
    d_pad = pl.cdiv(d, 128) * 128

    # Wide, lane-dense column tiles; then pack as many rows as the budget
    # allows (full (8,128) vreg occupancy and >= multi-KiB per-row DMA chunks).
    n_target = min(n, 256)
    col_tile = min(d_pad,
                   max(128, (block_bytes // (n_target * itemsize)) // 128 * 128))
    cap_rows = max(sub, (block_bytes // (col_tile * itemsize)) // sub * sub)
    n_tile = n if n <= cap_rows else cap_rows
    mask_cols = (d % col_tile) != 0

    cost = pl.CostEstimate(flops=6 * n * d, transcendentals=0,
                           bytes_accessed=2 * n * d * itemsize + n * 128 * 4)
    kernel = functools.partial(_dice_kernel_flat, smooth=float(smooth),
                               p_pow=p_pow, n_cols=d, mask_cols=mask_cols)
    out = pl.pallas_call(
        kernel,
        out_shape=jax.ShapeDtypeStruct((n, 128), jnp.float32),
        grid_spec=pltpu.PrefetchScalarGridSpec(
            num_scalar_prefetch=0,
            grid=(pl.cdiv(n, n_tile), pl.cdiv(d, col_tile)),
            in_specs=[
                pl.BlockSpec((n_tile, col_tile), lambda i, k: (i, k)),
                pl.BlockSpec((n_tile, col_tile), lambda i, k: (i, k)),
            ],
            out_specs=pl.BlockSpec((n_tile, 128), lambda i, k: (i, 0)),
            scratch_shapes=[
                pltpu.VMEM((n_tile, col_tile), jnp.float32),
                pltpu.VMEM((n_tile, col_tile), jnp.float32),
            ],
        ),
        compiler_params=pltpu.CompilerParams(
            dimension_semantics=("parallel", "arbitrary"),
            vmem_limit_bytes=_VMEM_LIMIT_BYTES,
        ),
        cost_estimate=cost,
    )(pr2, tg2)
    return out[:, 0]


# ---------------------------------------------------------------------------
# Public wrapper (matches BinaryDiceLoss.forward semantics).
# ---------------------------------------------------------------------------
def binary_dice_loss(predict, target, smooth=1e-6, p=2, reduction="mean",
                     block_bytes=None):
    assert predict.shape[0] == target.shape[0], \
        "predict & target batch size don't match"
    if block_bytes is None:
        block_bytes = _BLOCK_BYTES
    n = predict.shape[0]

    # Metadata-only flatten to [N, D] (matches torch .contiguous().view(N,-1)).
    pr = predict.reshape(n, -1)
    tg = target.reshape(n, -1)
    d = pr.shape[1]
    itemsize = jnp.dtype(pr.dtype).itemsize

    if d > 0 and d % 128 == 0:
        r = d // 128
        row_bytes = r * 128 * itemsize
        pr3 = pr.reshape(n, r, 128)
        tg3 = tg.reshape(n, r, 128)
        if n * row_bytes <= block_bytes or 8 * row_bytes <= block_bytes:
            loss = _dice_rowpack(pr3, tg3, smooth, p, block_bytes)
        else:
            loss = _dice_bigrow(pr3, tg3, smooth, p, block_bytes)
    else:
        loss = _dice_flat(pr, tg, smooth, p, block_bytes)

    if reduction == "mean":
        return jnp.mean(loss)
    elif reduction == "sum":
        return jnp.sum(loss)
    elif reduction == "none":
        return loss
    else:
        raise Exception("Unexpected reduction {}".format(reduction))


def _reference(predict, target, smooth=1e-6, p=2, reduction="mean"):
    n = predict.shape[0]
    pr = predict.reshape(n, -1).astype(jnp.float32)
    tg = target.reshape(n, -1).astype(jnp.float32)
    num = jnp.sum(pr * tg, axis=1) + smooth
    den = jnp.sum(pr ** p + tg ** p, axis=1) + smooth
    loss = 1.0 - num / den
    if reduction == "mean":
        return jnp.mean(loss)
    elif reduction == "sum":
        return jnp.sum(loss)
    return loss


if __name__ == "__main__":
    key = jax.random.PRNGKey(0)
    k1, k2 = jax.random.split(key)

    def check(predict, target, reduction="mean", block_bytes=None,
              atol=1e-5, rtol=1e-5, **kw):
        out = binary_dice_loss(predict, target, reduction=reduction,
                               block_bytes=block_bytes, **kw)
        out = jax.block_until_ready(out)
        ref = _reference(predict, target, reduction=reduction, **kw)
        assert jnp.allclose(out, ref, atol=atol, rtol=rtol), (out, ref)

    # 1) Dense row-packed path (D = 1024, single batch block).
    p1 = jax.random.uniform(k1, (2, 4, 16, 16), dtype=jnp.float32)
    t1 = (jax.random.uniform(k2, (2, 4, 16, 16)) > 0.5).astype(jnp.float32)
    check(p1, t1, reduction="mean")
    check(p1, t1, reduction="sum")
    check(p1, t1, reduction="mean", p=3)          # integer-pow denominator

    # 1b) bf16 inputs stream natively through the same path.
    check(p1.astype(jnp.bfloat16), t1.astype(jnp.bfloat16),
          reduction="none", atol=1e-4, rtol=1e-4)

    # 2) Dense row-packed with batch tiling (b_tile=8 < N=12); the tiny block
    #    budget is only to exercise the path at test-friendly sizes.
    p2 = jax.random.uniform(k1, (12, 4, 16, 16), dtype=jnp.float32)
    t2 = (jax.random.uniform(k2, (12, 4, 16, 16)) > 0.5).astype(jnp.float32)
    check(p2, t2, reduction="none", block_bytes=32 * 1024)

    # 3) Dense big-row path with default budget (row-packed, R=16) ...
    p3 = jax.random.uniform(k1, (2, 4, 32, 16), dtype=jnp.float32)
    t3 = (jax.random.uniform(k2, (2, 4, 32, 16)) > 0.5).astype(jnp.float32)
    check(p3, t3, reduction="mean")
    #    ... and forced feature tiling with an exact-divisor chunk (no mask).
    check(p3, t3, reduction="none", block_bytes=4 * 1024)

    # 4) Dense big-row path with a ragged last chunk (R=20, chunk=8).
    p4 = jax.random.uniform(k1, (2, 2560), dtype=jnp.float32)
    t4 = (jax.random.uniform(k2, (2, 2560)) > 0.5).astype(jnp.float32)
    check(p4, t4, reduction="none", block_bytes=4 * 1024)

    # 5) Flat fallback: ragged D (300), single masked feature step.
    p5 = jax.random.uniform(k1, (2, 3, 10, 10), dtype=jnp.float32)
    t5 = (jax.random.uniform(k2, (2, 3, 10, 10)) > 0.5).astype(jnp.float32)
    check(p5, t5, reduction="none")

    # 6) Flat fallback: D < 128 (partial edge block + mask).
    p6 = jax.random.uniform(k1, (3, 5), dtype=jnp.float32)
    t6 = (jax.random.uniform(k2, (3, 5)) > 0.5).astype(jnp.float32)
    check(p6, t6, reduction="none")

    # 7) Flat fallback: batch tiling + multi-step feature reduction + mask.
    p7 = jax.random.uniform(k1, (20, 5000), dtype=jnp.float32)
    t7 = (jax.random.uniform(k2, (20, 5000)) > 0.5).astype(jnp.float32)
    check(p7, t7, reduction="mean", block_bytes=8 * 1024)

    print("KERNEL_OK")
</pallas_src>

<mosaic_0001>
module attributes {stable_mosaic.version = 11 : i64} {
  func.func @_dice_kernel_rowpack(%arg0: i32, %arg1: memref<2x8x128xf32, #tpu.memory_space<vmem>>, %arg2: memref<2x8x128xf32, #tpu.memory_space<vmem>>, %arg3: memref<2x128xf32, #tpu.memory_space<vmem>>) attributes {dimension_semantics = [#tpu.dimension_semantics<parallel>], iteration_bounds = array<i64: 1>, scalar_prefetch = 0 : i64, scratch_operands = 0 : i64, tpu.core_type = #tpu.core_type<tc>, window_params = [{transform_indices = @transform_0, window_bounds = array<i64: 2, 8, 128>}, {transform_indices = @transform_1, window_bounds = array<i64: 2, 8, 128>}, {transform_indices = @transform_2, window_bounds = array<i64: 2, 128>}]} {
    %c0 = arith.constant 0 : index
    %c0_0 = arith.constant 0 : index
    %c0_1 = arith.constant 0 : index
    %0 = vector.load %arg1[%c0, %c0_0, %c0_1] : memref<2x8x128xf32, #tpu.memory_space<vmem>>, vector<2x8x128xf32>
    %c0_2 = arith.constant 0 : index
    %c0_3 = arith.constant 0 : index
    %c0_4 = arith.constant 0 : index
    %1 = vector.load %arg2[%c0_2, %c0_3, %c0_4] : memref<2x8x128xf32, #tpu.memory_space<vmem>>, vector<2x8x128xf32>
    %2 = arith.mulf %0, %1 : vector<2x8x128xf32>
    %3 = arith.mulf %0, %0 : vector<2x8x128xf32>
    %4 = arith.mulf %1, %1 : vector<2x8x128xf32>
    %5 = arith.addf %3, %4 : vector<2x8x128xf32>
    %cst = arith.constant dense<0.000000e+00> : vector<2x128xf32>
    %6 = vector.multi_reduction <add>, %2, %cst [1] : vector<2x8x128xf32> to vector<2x128xf32>
    %cst_5 = arith.constant dense<0.000000e+00> : vector<2xf32>
    %7 = vector.multi_reduction <add>, %6, %cst_5 [1] : vector<2x128xf32> to vector<2xf32>
    %8 = vector.shape_cast %7 : vector<2xf32> to vector<2x1xf32>
    %cst_6 = arith.constant 9.99999997E-7 : f32
    %9 = vector.broadcast %cst_6 : f32 to vector<2x1xf32>
    %10 = arith.addf %8, %9 : vector<2x1xf32>
    %cst_7 = arith.constant dense<0.000000e+00> : vector<2x128xf32>
    %11 = vector.multi_reduction <add>, %5, %cst_7 [1] : vector<2x8x128xf32> to vector<2x128xf32>
    %cst_8 = arith.constant dense<0.000000e+00> : vector<2xf32>
    %12 = vector.multi_reduction <add>, %11, %cst_8 [1] : vector<2x128xf32> to vector<2xf32>
    %13 = vector.shape_cast %12 : vector<2xf32> to vector<2x1xf32>
    %cst_9 = arith.constant 9.99999997E-7 : f32
    %14 = vector.broadcast %cst_9 : f32 to vector<2x1xf32>
    %15 = arith.addf %13, %14 : vector<2x1xf32>
    %16 = arith.divf %10, %15 : vector<2x1xf32>
    %cst_10 = arith.constant 1.000000e+00 : f32
    %17 = vector.broadcast %cst_10 : f32 to vector<2x1xf32>
    %18 = arith.subf %17, %16 : vector<2x1xf32>
    %19 = vector.shape_cast %18 : vector<2x1xf32> to vector<2x1xf32>
    %20 = vector.broadcast %19 : vector<2x1xf32> to vector<2x128xf32>
    %c0_11 = arith.constant 0 : index
    %c0_12 = arith.constant 0 : index
    %21 = vector.load %arg3[%c0_11, %c0_12] : memref<2x128xf32, #tpu.memory_space<vmem>>, vector<2x128xf32>
    tpu.vector_store %arg3[%c0_11, %c0_12], %20 {strides = array<i32>} : memref<2x128xf32, #tpu.memory_space<vmem>>, vector<2x128xf32>,
    return
  }
  func.func @transform_0(%arg0: i32) -> (i32, i32, i32) {
    %c0_i32 = arith.constant 0 : i32
    %c0_i32_0 = arith.constant 0 : i32
    %c0_i32_1 = arith.constant 0 : i32
    return %arg0, %c0_i32, %c0_i32_0 : i32, i32, i32
  }
  func.func @transform_1(%arg0: i32) -> (i32, i32, i32) {
    %c0_i32 = arith.constant 0 : i32
    %c0_i32_0 = arith.constant 0 : i32
    %c0_i32_1 = arith.constant 0 : i32
    return %arg0, %c0_i32, %c0_i32_0 : i32, i32, i32
  }
  func.func @transform_2(%arg0: i32) -> (i32, i32) {
    %c0_i32 = arith.constant 0 : i32
    %c0_i32_0 = arith.constant 0 : i32
    return %arg0, %c0_i32 : i32, i32
  }
}

</mosaic_0001>

<bundles_post_ra>
// kernel: tpu_custom_call.1
= control target key start
LH: loop header
LB: loop body
LE: loop exit
PB: predicated region body
PF: predicated region fallthrough
CT: control target
= control target key end

     0   :  { %7 = vsyncpa [#allocation3], 0  ;;  %s249_s0 = inlined_call_operand.hbm [shape: f32[2,8,128], index: 0, kind: input, shape index: {}]   ;;  %s250_s1 = inlined_call_operand.hbm [shape: f32[2,8,128], index: 1, kind: input, shape index: {}]   ;;  %s251_s2 = inlined_call_operand.hbm [shape: f32[2,128], index: 2, kind: output, shape index: {}]  }
   0x1   :  { %8 = vsyncpa [#allocation6], 0 }
   0x2   :  { %9 = vsyncpa [#allocation4], 0  ;;  %s193_s9 = smov [#allocation2]   ;;  %s121_s13 = scalar_lea.hbm %s249_s0, 256 }
   0x3   :  { %s15_s10 = sshll.u32 %s193_s9, 4  ;;  %p122_p0 = scmp.ne.s32.totalorder %s249_s0, %s121_s13  ;;  %s16_s10 = int_to_ptr.vmem [resolvable:$true] %s15_s10 }
   0x4   :  { %p125_p1 = scmp.lt.u32.totalorder %s121_s13, %s249_s0 }
   0x6   :  { %p127_p2 = pnand %p125_p1, %p122_p0 }
   0x8   :  { %130 = shalt.err (!%p127_p2)
}
   0x9   :  { %s131_s18 = scalar_lea.vmem %s16_s10, 256  ;;  %p136_p4 = scmp.lt.s32.totalorder %s16_s10, %s16_s10 }
   0xa   :  { %p132_p3 = scmp.ne.s32.totalorder %s16_s10, %s131_s18  ;;  %p137_p5 = scmp.lt.s32.totalorder %s131_s18, %s131_s18 }
   0xc   :  { %p138_p6 = por %p137_p5, %p136_p4 }
   0xe   :  { %p139_p7 = pnand %p138_p6, %p132_p3 }
  0x10   :  { %142 = shalt.err (!%p139_p7)
}
  0x11   :  { %s194_s19 = smov 128   ;;  %s195_s20 = smov 8  }
  0x12   :  { %21 = dma.hbm_to_vmem [thread:$0]  %s249_s0, 256, %s16_s10, [#allocation3], %s194_s19, %s194_s19, %s195_s20  }
  0x13   :  { %s196_s23 = smov [#allocation5]   ;;  %s143_s27 = scalar_lea.hbm %s250_s1, 256 }
  0x14   :  { %s27_s24 = sshll.u32 %s196_s23, 4  ;;  %p144_p8 = scmp.ne.s32.totalorder %s250_s1, %s143_s27  ;;  %s28_s24 = int_to_ptr.vmem [resolvable:$true] %s27_s24 }
  0x15   :  { %p147_p9 = scmp.lt.u32.totalorder %s143_s27, %s250_s1 }
  0x17   :  { %p149_p10 = pnand %p147_p9, %p144_p8 }
  0x19   :  { %152 = shalt.err (!%p149_p10)
}
  0x1a   :  { %s153_s4 = scalar_lea.vmem %s28_s24, 256  ;;  %p158_p12 = scmp.lt.s32.totalorder %s28_s24, %s28_s24 }
  0x1b   :  { %p154_p11 = scmp.ne.s32.totalorder %s28_s24, %s153_s4  ;;  %p159_p13 = scmp.lt.s32.totalorder %s153_s4, %s153_s4 }
  0x1d   :  { %p160_p0 = por %p159_p13, %p158_p12 }
  0x1f   :  { %p161_p1 = pnand %p160_p0, %p154_p11 }
  0x21   :  { %164 = shalt.err (!%p161_p1)
}
  0x22   :  { %33 = dma.hbm_to_vmem [thread:$0]  %s250_s1, 256, %s28_s24, [#allocation6], %s194_s19, %s194_s19, %s195_s20  }
  0x23   :  { %187 = dma.done.wait [#allocation3], 256  }
  0x24   :  { %188 = vsyncadd [#allocation3], 4294967040 }
  0x25   :  { %189 = dma.done.wait [#allocation6], 256  }
  0x26   :  { %190 = vsyncadd [#allocation6], 4294967040  ;;  %v40_v0 = vld [vmem:[#allocation2] sm:$0xff]  ;;  %v41_v1 = vld [vmem:[#allocation2 + $0x8] sm:$0xff]  ;;  %vm66_vm0 = vcmask 1041409   ;;  %vm69_vm1 = vcmask 1041408  }
  0x27   :  { %v42_v2 = vld [vmem:[#allocation5] sm:$0xff]  ;;  %v43_v3 = vld [vmem:[#allocation5 + $0x8] sm:$0xff]  ;;  %v46_v4 = vmul.f32 %v40_v0, %v40_v0  ;;  %v47_v5 = vmul.f32 %v41_v1, %v41_v1  ;;  %s197_s1 = smov [#allocation7]  }
  0x28   :  { %v48_v6 = vmul.f32 %v42_v2, %v42_v2  ;;  %v44_v7 = vmul.f32 %v42_v2, %v40_v0  ;;  %v49_v8 = vmul.f32 %v43_v3, %v43_v3  ;;  %v45_v9 = vmul.f32 %v43_v3, %v41_v1  ;;  %s104_s6 = sshll.u32 %s197_s1, 4  ;;  %s105_s6 = int_to_ptr.vmem [resolvable:$true] %s104_s6 }
  0x29   :  { %s165_s7 = scalar_lea.vmem %s105_s6, 32  ;;  %p170_p3 = scmp.lt.s32.totalorder %s105_s6, %s105_s6 }
  0x2a   :  { %v50_v10 = vadd.f32 %v48_v6, %v46_v4  ;;  %v52_v11 = vrot.slane %v44_v7, 4  ;;  %v51_v12 = vadd.f32 %v49_v8, %v47_v5  ;;  %v58_v13 = vrot.slane %v45_v9, 4  ;;  %p166_p2 = scmp.ne.s32.totalorder %s105_s6, %s165_s7  ;;  %p171_p4 = scmp.lt.s32.totalorder %s165_s7, %s165_s7 }
  0x2c   :  { %v74_v14 = vrot.slane %v50_v10, 4  ;;  %v53_v15 = vadd.f32 %v52_v11, %v44_v7  ;;  %v80_v16 = vrot.slane %v51_v12, 4  ;;  %v59_v17 = vadd.f32 %v58_v13, %v45_v9  ;;  %p172_p5 = por %p171_p4, %p170_p3 }
  0x2e   :  { %v75_v18 = vadd.f32 %v74_v14, %v50_v10  ;;  %v54_v19 = vrot.slane %v53_v15, 2  ;;  %v81_v20 = vadd.f32 %v80_v16, %v51_v12  ;;  %v60_v21 = vrot.slane %v59_v17, 2  ;;  %p173_p6 = pnand %p172_p5, %p166_p2 }
  0x30   :  { %v76_v22 = vrot.slane %v75_v18, 2  ;;  %v55_v23 = vadd.f32 %v54_v19, %v53_v15  ;;  %v82_v24 = vrot.slane %v81_v20, 2  ;;  %v61_v25 = vadd.f32 %v60_v21, %v59_v17 }
  0x32   :  { %v77_v26 = vadd.f32 %v76_v22, %v75_v18  ;;  %v56_v27 = vrot.slane %v55_v23, 1  ;;  %v83_v28 = vadd.f32 %v82_v24, %v81_v20  ;;  %v62_v29 = vrot.slane %v61_v25, 1 }
  0x34   :  { %v78_v30 = vrot.slane %v77_v26, 1  ;;  %v84_v31 = vrot.slane %v83_v28, 1  ;;  %v57_v32 = vadd.f32 %v56_v27, %v55_v23  ;;  %v63_v33 = vadd.f32 %v62_v29, %v61_v25 }
  0x36   :  { %v79_v34 = vadd.f32 %v78_v30, %v77_v26  ;;  %v85_v35 = vadd.f32 %v84_v31, %v83_v28  ;;  %v67_v37 = vsel %vm66_vm0, %v63_v33, %v57_v32 }
  0x37   :  { %v70_v39 = vsel %vm69_vm1, %v67_v37, 0.0 }
  0x38   :  { %v88_v36 = vsel %vm66_vm0, %v85_v35, %v79_v34 }
  0x39   :  { %v90_v38 = vsel %vm69_vm1, %v88_v36, 0.0 }
  0x3a   :  { %91 = vadd.xlane.f32.xlu0 %v90_v38 }
  0x3e   :  { %71 = vadd.xlane.f32.xlu0 %v70_v39 }
  0xc7   :  { %v92_v40 = vpop.xlane.xlu0 %91 }
  0xc8   :  { %v93_v41 = vadd.f32 1e-06, %v92_v40 }
  0xca   :  { %119 = vrcp.f32 %v93_v41 }
  0xcb   :  { %v72_v42 = vpop.xlane.xlu0 %71 }
  0xcc   :  { %v73_v43 = vadd.f32 1e-06, %v72_v42 }
  0xd4   :  { %v120_v44 = vpop.eup %119 }
  0xd5   :  { %v95_v45 = vmul.f32 %v120_v44, %v73_v43 }
  0xd7   :  { %v96_v46 = vsub.f32 1.0, %v95_v45 }
  0xd9   :  { %97 = vst [vmem:[#allocation7] sm:$0x3] %v96_v46 }
  0xda   :  { %176 = shalt.err (!%p173_p6)
}
  0xdb   :  { %s177_s10 = scalar_lea.hbm %s251_s2, 32 }
  0xdc   :  { %p178_p7 = scmp.ne.s32.totalorder %s251_s2, %s177_s10  ;;  %p181_p8 = scmp.lt.u32.totalorder %s177_s10, %s251_s2 }
  0xde   :  { %p183_p9 = pnand %p181_p8, %p178_p7 }
  0xe0   :  { %186 = shalt.err (!%p183_p9)
}
  0xe1   :  { %107 = dma.vmem_to_hbm [thread:$0]  %s105_s6, 32, %s251_s2, [#allocation4]  }
  0xe2   :  { %191 = dma.done.wait [#allocation4], 32  }
  0xe3   :  { %192 = vsyncadd [#allocation4], 4294967264 }
  0xe4   :  { %111 = vsyncpa [#allocation3], 1 }
  0xe5   :  { %112 = vsyncpa [#allocation6], 1 }
  0xe6   :  { %113 = vsyncpa [#allocation4], 1 }

</bundles_post_ra>
